<compile_context>
chip_gen: v7x
topology: tpu7x:2x2x1
jax: 0.10.0
libtpu: 0.0.40
codegen_flags: <defaults>
</compile_context>

<pallas_src>
import functools

import jax
import jax.numpy as jnp
from jax.experimental import pallas as pl
from jax.experimental.pallas import tpu as pltpu

BN_EPS = 1e-5
VMEM_LIMIT_BYTES = 32 * 1024 * 1024   # safe on v5e/v6e/v7x


# ----------------------------------------------------------------------------
# Pallas kernel. Tiles are (channels, spatial): channels on sublanes, spatial
# pixels on lanes.
#   h   = relu(Wg @ g + Wx @ x + (bg + bx))   (folded Conv1x1 + BN, both branches)
#   psi = sigmoid(Wp @ h + bp)                (folded Conv1x1 + BN + Sigmoid)
#   out = x * psi
# ----------------------------------------------------------------------------
def _attention_kernel(g_ref, x_ref, wg_ref, wx_ref, bh_ref, wp_ref, bp_ref,
                      out_ref):
    gf = g_ref[...].astype(jnp.float32)   # (F_g, ts)
    xf = x_ref[...].astype(jnp.float32)   # (F_l, ts)

    h = (jnp.dot(wg_ref[...], gf, preferred_element_type=jnp.float32)
         + jnp.dot(wx_ref[...], xf, preferred_element_type=jnp.float32)
         + bh_ref[...])                   # (F_int, ts); biases pre-summed on host
    h = jnp.maximum(h, 0.0)

    p = jnp.dot(wp_ref[...], h, preferred_element_type=jnp.float32) + bp_ref[...]
    # sigmoid via EUP exp + approx reciprocal (free slots; kernel is mem-bound)
    psi = pl.reciprocal(1.0 + jnp.exp(-p), approx=True)   # (F_out, ts)

    out_ref[...] = (xf * psi).astype(out_ref.dtype)


def _fold_bn(w, b, gamma, beta, mean, var):
    """Fold eval-mode BatchNorm into a 1x1 conv. w: (C_out, C_in), b: (C_out,)."""
    scale = gamma / jnp.sqrt(var + BN_EPS)            # (C_out,)
    w_eff = w * scale[:, None]                        # (C_out, C_in)
    b_eff = (b - mean) * scale + beta                 # (C_out,)
    return w_eff, b_eff


def _pick_spatial_tile(HW, F_g, F_l, itemsize):
    """Largest lane tile (multiple of 128) that fits a conservative VMEM budget."""
    if HW <= 128:
        return HW                                      # full extent (exempt from 128 rule)
    # Double-buffered g/x input blocks + out block, f32 compute copies ignored
    # (they live in vregs / small scratch).
    bytes_per_pixel = (F_g + 2 * F_l) * itemsize * 2
    budget = VMEM_LIMIT_BYTES // 2
    ts_cap = max(128, min(8192, (budget // bytes_per_pixel) // 128 * 128))
    if HW <= ts_cap:
        # round HW up to the next multiple of 128 only if it already is one;
        # otherwise use the full extent (allowed when block == full dim).
        return HW
    # Prefer a tile that divides HW exactly (no trailing masked stores).
    for ts in range(ts_cap, 127, -128):
        if HW % ts == 0:
            return ts
    return ts_cap                                      # ragged last tile, masked


@jax.jit
def attention_block(g, x, params):
    """g, x: NCHW arrays (f32 or bf16). Returns NCHW output, same shape/dtype as x."""
    N, F_g, H, W = g.shape
    _, F_l, _, _ = x.shape
    F_int = params["wg"].shape[0]
    F_out = params["wp"].shape[0]
    if F_out != F_l:
        # forward does x * psi elementwise; shapes must match (no broadcast)
        raise ValueError(f"AttentionBlock requires F_l == 2*F_int (got F_l={F_l},"
                         f" psi channels={F_out})")
    HW = H * W

    # Fold BN into each 1x1 conv; weights already in (C_out, C_in) = W @ X form.
    wg, bg = _fold_bn(params["wg"], params["bg"], params["gamma_g"],
                      params["beta_g"], params["mean_g"], params["var_g"])
    wx, bx = _fold_bn(params["wx"], params["bx"], params["gamma_x"],
                      params["beta_x"], params["mean_x"], params["var_x"])
    wp, bp = _fold_bn(params["wp"], params["bp"], params["gamma_p"],
                      params["beta_p"], params["mean_p"], params["var_p"])
    bh = (bg + bx).reshape(F_int, 1)      # broadcast along lanes inside kernel
    bp2 = bp.reshape(F_out, 1)

    # Free reshapes: NCHW -> (N, C, H*W). No data movement, no extra HBM pass.
    g3 = g.reshape(N, F_g, HW)
    x3 = x.reshape(N, F_l, HW)

    # Spatial (lane) tile selection (shapes are static at trace time).
    ts = _pick_spatial_tile(HW, F_g, F_l, jnp.dtype(x.dtype).itemsize)
    # Keep >= 2 grid steps so both v7x TensorCores get work (no-op on v5e/v6e).
    if N * pl.cdiv(HW, ts) < 2 and HW % 256 == 0:
        ts = HW // 2
    grid = (N, pl.cdiv(HW, ts))

    act = lambda n, s: (n, 0, s)
    full = lambda n, s: (0, 0)
    out3 = pl.pallas_call(
        _attention_kernel,
        out_shape=jax.ShapeDtypeStruct((N, F_l, HW), x.dtype),
        grid_spec=pltpu.PrefetchScalarGridSpec(
            num_scalar_prefetch=0,
            grid=grid,
            in_specs=[
                pl.BlockSpec((None, F_g, ts), act),     # g  (batch squeezed)
                pl.BlockSpec((None, F_l, ts), act),     # x
                pl.BlockSpec((F_int, F_g), full),       # Wg (folded)
                pl.BlockSpec((F_int, F_l), full),       # Wx (folded)
                pl.BlockSpec((F_int, 1), full),         # bg + bx
                pl.BlockSpec((F_out, F_int), full),     # Wpsi (folded)
                pl.BlockSpec((F_out, 1), full),         # bpsi
            ],
            out_specs=pl.BlockSpec((None, F_l, ts), act),
        ),
        compiler_params=pltpu.CompilerParams(
            dimension_semantics=("parallel", "parallel"),
            vmem_limit_bytes=VMEM_LIMIT_BYTES,
        ),
    )(g3, x3, wg, wx, bh, wp, bp2)

    return out3.reshape(N, F_l, H, W)


# ----------------------------------------------------------------------------
# Pure-JAX reference (eval-mode BN), for a correctness cross-check.
# ----------------------------------------------------------------------------
def attention_block_ref(g, x, params):
    def conv_bn(inp, w, b, gamma, beta, mean, var):
        y = jnp.einsum("nchw,oc->nohw", inp, w) + b[None, :, None, None]
        scale = gamma / jnp.sqrt(var + BN_EPS)
        return (y - mean[None, :, None, None]) * scale[None, :, None, None] \
               + beta[None, :, None, None]

    g1 = conv_bn(g, params["wg"], params["bg"], params["gamma_g"],
                 params["beta_g"], params["mean_g"], params["var_g"])
    x1 = conv_bn(x, params["wx"], params["bx"], params["gamma_x"],
                 params["beta_x"], params["mean_x"], params["var_x"])
    h = jnp.maximum(g1 + x1, 0.0)
    p = conv_bn(h, params["wp"], params["bp"], params["gamma_p"],
                params["beta_p"], params["mean_p"], params["var_p"])
    p = jax.nn.sigmoid(p)
    return x * p


def make_params(key, F_g, F_l, F_int):
    F_out = 2 * F_int
    ks = jax.random.split(key, 12)
    p = {
        "wg": jax.random.normal(ks[0], (F_int, F_g), jnp.float32) * 0.2,
        "bg": jax.random.normal(ks[1], (F_int,), jnp.float32) * 0.1,
        "wx": jax.random.normal(ks[2], (F_int, F_l), jnp.float32) * 0.2,
        "bx": jax.random.normal(ks[3], (F_int,), jnp.float32) * 0.1,
        "wp": jax.random.normal(ks[4], (F_out, F_int), jnp.float32) * 0.2,
        "bp": jax.random.normal(ks[5], (F_out,), jnp.float32) * 0.1,
        # BatchNorm (eval-mode running stats + affine), deterministic:
        "gamma_g": 1.0 + 0.1 * jax.random.normal(ks[6], (F_int,), jnp.float32),
        "beta_g": 0.05 * jax.random.normal(ks[7], (F_int,), jnp.float32),
        "mean_g": 0.1 * jax.random.normal(ks[8], (F_int,), jnp.float32),
        "var_g": jnp.abs(1.0 + 0.1 * jax.random.normal(ks[9], (F_int,), jnp.float32)),
        "gamma_x": 1.0 + 0.1 * jax.random.normal(ks[10], (F_int,), jnp.float32),
        "beta_x": 0.05 * jax.random.normal(ks[11], (F_int,), jnp.float32),
        "mean_x": jnp.zeros((F_int,), jnp.float32),
        "var_x": jnp.ones((F_int,), jnp.float32),
        "gamma_p": jnp.ones((F_out,), jnp.float32),
        "beta_p": jnp.zeros((F_out,), jnp.float32),
        "mean_p": jnp.zeros((F_out,), jnp.float32),
        "var_p": jnp.ones((F_out,), jnp.float32),
    }
    return p
    # TODO(synk): training-mode BatchNorm (batch statistics) not implemented;
    # eval-mode (running-stats) BN is folded into the 1x1 convs instead.


if __name__ == "__main__":
    # Forward does `x * psi` with psi having 2*F_int channels, so the module is
    # only shape-consistent when F_l == 2*F_int.
    N, H, W = 2, 16, 16
    F_g, F_l, F_int = 8, 8, 4

    key = jax.random.PRNGKey(0)
    kg, kx, kp = jax.random.split(key, 3)
    g = jax.random.normal(kg, (N, F_g, H, W), jnp.float32)
    x = jax.random.normal(kx, (N, F_l, H, W), jnp.float32)
    params = make_params(kp, F_g, F_l, F_int)

    out = jax.block_until_ready(attention_block(g, x, params))
    ref = attention_block_ref(g, x, params)
    assert out.shape == x.shape
    # approx-reciprocal sigmoid => slightly looser tolerance than exact sigmoid
    max_err = jnp.max(jnp.abs(out - ref))
    assert jnp.allclose(out, ref, atol=2e-2, rtol=2e-2), f"max err {max_err}"

    # bf16 HBM I/O path (halves activation bandwidth; compute stays f32 in-kernel)
    out_bf16 = jax.block_until_ready(
        attention_block(g.astype(jnp.bfloat16), x.astype(jnp.bfloat16), params))
    assert out_bf16.shape == x.shape
    assert bool(jnp.all(jnp.isfinite(out_bf16.astype(jnp.float32))))

    print("KERNEL_OK")
</pallas_src>

<mosaic_0001>
module attributes {stable_mosaic.version = 11 : i64} {
  func.func @_attention_kernel(%arg0: i32, %arg1: i32, %arg2: memref<1x8x256xf32, #tpu.memory_space<vmem>>, %arg3: memref<1x8x256xf32, #tpu.memory_space<vmem>>, %arg4: memref<4x8xf32, #tpu.memory_space<vmem>>, %arg5: memref<4x8xf32, #tpu.memory_space<vmem>>, %arg6: memref<4x1xf32, #tpu.memory_space<vmem>>, %arg7: memref<8x4xf32, #tpu.memory_space<vmem>>, %arg8: memref<8x1xf32, #tpu.memory_space<vmem>>, %arg9: memref<1x8x256xf32, #tpu.memory_space<vmem>>) attributes {dimension_semantics = [#tpu.dimension_semantics<parallel>, #tpu.dimension_semantics<parallel>], iteration_bounds = array<i64: 2, 1>, scalar_prefetch = 0 : i64, scratch_operands = 0 : i64, tpu.core_type = #tpu.core_type<tc>, window_params = [{transform_indices = @transform_0, window_bounds = array<i64: 1, 8, 256>}, {transform_indices = @transform_1, window_bounds = array<i64: 1, 8, 256>}, {pipeline_mode = #tpu.pipeline_mode<synchronous>, transform_indices = @transform_2, window_bounds = array<i64: 4, 8>}, {pipeline_mode = #tpu.pipeline_mode<synchronous>, transform_indices = @transform_3, window_bounds = array<i64: 4, 8>}, {pipeline_mode = #tpu.pipeline_mode<synchronous>, transform_indices = @transform_4, window_bounds = array<i64: 4, 1>}, {pipeline_mode = #tpu.pipeline_mode<synchronous>, transform_indices = @transform_5, window_bounds = array<i64: 8, 4>}, {pipeline_mode = #tpu.pipeline_mode<synchronous>, transform_indices = @transform_6, window_bounds = array<i64: 8, 1>}, {transform_indices = @transform_7, window_bounds = array<i64: 1, 8, 256>}]} {
    %c0 = arith.constant 0 : index
    %c0_0 = arith.constant 0 : index
    %c0_1 = arith.constant 0 : index
    %0 = vector.load %arg2[%c0, %c0_0, %c0_1] : memref<1x8x256xf32, #tpu.memory_space<vmem>>, vector<1x8x256xf32>
    %1 = vector.shape_cast %0 : vector<1x8x256xf32> to vector<8x256xf32>
    %c0_2 = arith.constant 0 : index
    %c0_3 = arith.constant 0 : index
    %c0_4 = arith.constant 0 : index
    %2 = vector.load %arg3[%c0_2, %c0_3, %c0_4] : memref<1x8x256xf32, #tpu.memory_space<vmem>>, vector<1x8x256xf32>
    %3 = vector.shape_cast %2 : vector<1x8x256xf32> to vector<8x256xf32>
    %c0_5 = arith.constant 0 : index
    %c0_6 = arith.constant 0 : index
    %4 = vector.load %arg4[%c0_5, %c0_6] : memref<4x8xf32, #tpu.memory_space<vmem>>, vector<4x8xf32>
    %cst = arith.constant dense<0.000000e+00> : vector<4x256xf32>
    %5 = tpu.matmul %4, %1, %cst {dimension_numbers = #tpu.dot_dimension_numbers<[1], [0], [0], [1], [0, 0, 1, 1], [], []>} : vector<4x8xf32>, vector<8x256xf32>, vector<4x256xf32> -> vector<4x256xf32>
    %c0_7 = arith.constant 0 : index
    %c0_8 = arith.constant 0 : index
    %6 = vector.load %arg5[%c0_7, %c0_8] : memref<4x8xf32, #tpu.memory_space<vmem>>, vector<4x8xf32>
    %cst_9 = arith.constant dense<0.000000e+00> : vector<4x256xf32>
    %7 = tpu.matmul %6, %3, %cst_9 {dimension_numbers = #tpu.dot_dimension_numbers<[1], [0], [0], [1], [0, 0, 1, 1], [], []>} : vector<4x8xf32>, vector<8x256xf32>, vector<4x256xf32> -> vector<4x256xf32>
    %8 = arith.addf %5, %7 : vector<4x256xf32>
    %c0_10 = arith.constant 0 : index
    %c0_11 = arith.constant 0 : index
    %9 = vector.load %arg6[%c0_10, %c0_11] : memref<4x1xf32, #tpu.memory_space<vmem>>, vector<4x1xf32>
    %10 = vector.broadcast %9 : vector<4x1xf32> to vector<4x256xf32>
    %11 = arith.addf %8, %10 : vector<4x256xf32>
    %cst_12 = arith.constant 0.000000e+00 : f32
    %12 = vector.broadcast %cst_12 : f32 to vector<4x256xf32>
    %13 = arith.maximumf %11, %12 : vector<4x256xf32>
    %c0_13 = arith.constant 0 : index
    %c0_14 = arith.constant 0 : index
    %14 = vector.load %arg7[%c0_13, %c0_14] : memref<8x4xf32, #tpu.memory_space<vmem>>, vector<8x4xf32>
    %cst_15 = arith.constant dense<0.000000e+00> : vector<8x256xf32>
    %15 = tpu.matmul %14, %13, %cst_15 {dimension_numbers = #tpu.dot_dimension_numbers<[1], [0], [0], [1], [0, 0, 1, 1], [], []>} : vector<8x4xf32>, vector<4x256xf32>, vector<8x256xf32> -> vector<8x256xf32>
    %c0_16 = arith.constant 0 : index
    %c0_17 = arith.constant 0 : index
    %16 = vector.load %arg8[%c0_16, %c0_17] : memref<8x1xf32, #tpu.memory_space<vmem>>, vector<8x1xf32>
    %17 = vector.broadcast %16 : vector<8x1xf32> to vector<8x256xf32>
    %18 = arith.addf %15, %17 : vector<8x256xf32>
    %cst_18 = arith.constant 0.000000e+00 : f32
    %19 = vector.broadcast %cst_18 : f32 to vector<8x256xf32>
    %20 = arith.subf %19, %18 : vector<8x256xf32>
    %21 = math.exp %20 : vector<8x256xf32>
    %cst_19 = arith.constant 1.000000e+00 : f32
    %22 = vector.broadcast %cst_19 : f32 to vector<8x256xf32>
    %23 = arith.addf %22, %21 : vector<8x256xf32>
    %24 = tpu.reciprocal %23 {approx = true} : vector<8x256xf32> -> vector<8x256xf32>
    %25 = arith.mulf %3, %24 : vector<8x256xf32>
    %c0_20 = arith.constant 0 : index
    %c0_21 = arith.constant 0 : index
    %c0_22 = arith.constant 0 : index
    %26 = vector.load %arg9[%c0_20, %c0_21, %c0_22] : memref<1x8x256xf32, #tpu.memory_space<vmem>>, vector<1x8x256xf32>
    %27 = vector.shape_cast %26 : vector<1x8x256xf32> to vector<8x256xf32>
    %28 = vector.shape_cast %25 : vector<8x256xf32> to vector<1x8x256xf32>
    tpu.vector_store %arg9[%c0_20, %c0_21, %c0_22], %28 {strides = array<i32>} : memref<1x8x256xf32, #tpu.memory_space<vmem>>, vector<1x8x256xf32>,
    return
  }
  func.func @transform_0(%arg0: i32, %arg1: i32) -> (i32, i32, i32) {
    %c0_i32 = arith.constant 0 : i32
    %c0_i32_0 = arith.constant 0 : i32
    return %arg0, %c0_i32, %arg1 : i32, i32, i32
  }
  func.func @transform_1(%arg0: i32, %arg1: i32) -> (i32, i32, i32) {
    %c0_i32 = arith.constant 0 : i32
    %c0_i32_0 = arith.constant 0 : i32
    return %arg0, %c0_i32, %arg1 : i32, i32, i32
  }
  func.func @transform_2(%arg0: i32, %arg1: i32) -> (i32, i32) {
    %c0_i32 = arith.constant 0 : i32
    %c0_i32_0 = arith.constant 0 : i32
    %c0_i32_1 = arith.constant 0 : i32
    return %c0_i32, %c0_i32_0 : i32, i32
  }
  func.func @transform_3(%arg0: i32, %arg1: i32) -> (i32, i32) {
    %c0_i32 = arith.constant 0 : i32
    %c0_i32_0 = arith.constant 0 : i32
    %c0_i32_1 = arith.constant 0 : i32
    return %c0_i32, %c0_i32_0 : i32, i32
  }
  func.func @transform_4(%arg0: i32, %arg1: i32) -> (i32, i32) {
    %c0_i32 = arith.constant 0 : i32
    %c0_i32_0 = arith.constant 0 : i32
    %c0_i32_1 = arith.constant 0 : i32
    return %c0_i32, %c0_i32_0 : i32, i32
  }
  func.func @transform_5(%arg0: i32, %arg1: i32) -> (i32, i32) {
    %c0_i32 = arith.constant 0 : i32
    %c0_i32_0 = arith.constant 0 : i32
    %c0_i32_1 = arith.constant 0 : i32
    return %c0_i32, %c0_i32_0 : i32, i32
  }
  func.func @transform_6(%arg0: i32, %arg1: i32) -> (i32, i32) {
    %c0_i32 = arith.constant 0 : i32
    %c0_i32_0 = arith.constant 0 : i32
    %c0_i32_1 = arith.constant 0 : i32
    return %c0_i32, %c0_i32_0 : i32, i32
  }
  func.func @transform_7(%arg0: i32, %arg1: i32) -> (i32, i32, i32) {
    %c0_i32 = arith.constant 0 : i32
    %c0_i32_0 = arith.constant 0 : i32
    return %arg0, %c0_i32, %arg1 : i32, i32, i32
  }
}

</mosaic_0001>

<bundles_post_ra>
// kernel: attention_block.1
= control target key start
LH: loop header
LB: loop body
LE: loop exit
PB: predicated region body
PF: predicated region fallthrough
CT: control target
= control target key end

     0   :  { %s851_s24 = smov 0   ;;  %s853_s25 = smov 0   ;;  %s907_s0 = inlined_call_operand.vmem [shape: f32[2,8,256], index: 0, kind: input, shape index: {}]   ;;  %s908_s1 = inlined_call_operand.vmem [shape: f32[2,8,256], index: 1, kind: input, shape index: {}]   ;;  %s909_s2 = inlined_call_operand.vmem [shape: f32[4,8], index: 2, kind: input, shape index: {}]   ;;  %s910_s3 = inlined_call_operand.vmem [shape: f32[4,8], index: 3, kind: input, shape index: {}]   ;;  %s911_s4 = inlined_call_operand.vmem [shape: f32[4,1], index: 4, kind: input, shape index: {}]   ;;  %s912_s5 = inlined_call_operand.vmem [shape: f32[8,4], index: 5, kind: input, shape index: {}]   ;;  %s913_s6 = inlined_call_operand.vmem [shape: f32[8,1], index: 6, kind: input, shape index: {}]   ;;  %s914_s7 = inlined_call_operand.vmem [shape: f32[2,8,256], index: 7, kind: output, shape index: {}]  }
   0x1   :  { %s855_s26 = smov 0  }
   0x2 LB: > { %s29_s27 = sadd.s32 1, %s803_s25  ;;  %p731_p0 = scmp.ge.s32.totalorder %s807_s26, 1  ;;  %s807_s26 = sphi %s855_s26, %s17_s26   ;;  %s803_s25 = sphi %s853_s25, %s916_s25   ;;  %s799_s24 = sphi %s851_s24, %s915_s24  }
   0x3   : > { %p31_p1 = scmp.ge.s32.totalorder %s29_s27, 2  ;;  %p275_p2 = scmp.lt.s32.totalorder %s807_s26, 3 }
   0x5   : > { %s918_s27 = smov (%p31_p1, %s29_s27), 0  ;;  %p276_p3 = pnand %p731_p0, %p275_p2 }
   0x6   : > { %p325_p4 = scmp.lt.s32.totalorder (!%p276_p3), %s799_s24, 1  ;;  %v809_v0 = vmov (!%p276_p3), 0.0   ;;  %v810_v1 = vmov (!%p276_p3), 0   ;;  %v509_v2 = vld [vmem:[%s911_s4] sm:$0xf] (!%p276_p3)  ;;  %vm360_vm0 = vcmask (!%p276_p3), 64512  }
   0x7   : > { %279 = sbr.rel (%p276_p3) target bundleno = 493 (0x1ed), region = 48  ;;  %428 = vmatprep.mubr.f32.mxu0 (!%p276_p3), %v809_v0  ;;  %776 = vset.pattern.permute.xlu0 (!%p276_p3), %v810_v1  ;;  %v520_v3 = vld [vmem:[%s913_s6] sm:$0xff] (!%p276_p3)  ;;  %vm530_vm1 = vcmask (!%p276_p3), 1043456   ;;  %vm526_vm2 = vcmask (!%p276_p3), 31744  }
   0x8   : > { %512 = vperm.xlu0 (!%p276_p3), %776, %v509_v2   ;;  %601 = vmatprep.mubr.f32.mxu1 (!%p276_p3), %v809_v0  ;;  %v359_v6 = vld [vmem:[%s910_s3] sm:$0xf] (!%p276_p3) }
   0x9   : > { %v358_v9 = vld [vmem:[%s909_s2] sm:$0xf] (!%p276_p3) }
   0xa   : > { %v519_v17 = vld [vmem:[%s912_s5] sm:$0xff] (!%p276_p3) }
   0xc   : > { %523 = vperm.xlu0 (!%p276_p3), %776, %v520_v3  }
   0xe   : > { %s920_s24 = smov (!%p325_p4, %s799_s24), 1 }
   0xf   : > { %s875_s9 = sshll.u32 %s920_s24, 4 }
  0x10   : > { %s342_s12 = scalar_lea.vmem %s908_s1, %s875_s9  ;;  %s332_s17 = scalar_lea.vmem %s907_s0, %s875_s9 }
  0x11   : > { %v357_v4 = vld [vmem:[%s342_s12 + $0x8] sm:$0xff]  ;;  %v356_v5 = vld [vmem:[%s342_s12] sm:$0xff]  ;;  %s352_s24 = scalar_lea.vmem %s914_s7, %s875_s9 }
  0x12   : > { %364 = vmatprep.subr.mxu0 %v357_v4  ;;  %v355_v7 = vld [vmem:[%s332_s17 + $0x8] sm:$0xff]  ;;  %v354_v8 = vld [vmem:[%s332_s17] sm:$0xff] }
  0x13   : > { %365 = vmatpush1.msra.mxu0 %v356_v5 }
  0x14   : > { %738 = vmatmul.mubr.msk.f32.vlgmr.msra.gmra.mrb[0].mxu0 %vm360_vm0, %v359_v6  ;;  %438 = vmatprep.subr.mxu0 %v355_v7 }
  0x15   : > { %439 = vmatpush1.msra.mxu0 %v354_v8  ;;  %502 = vmatprep.mubr.f32.mxu0 %v809_v0 }
  0x1c   : > { %739 = vmatmul.mubr.msk.f32.vlgmr.msra.gmra.mrb[0].mxu0 %vm360_vm0, %v358_v9 }
  0x87   : > { %v513_v10 = vpop.permute.xlu0 %512 }
  0x8b   : > { %v524_v18 = vpop.permute.xlu0 %523 }
  0xef   : > { %v504_v11 = vpop.f32.mrb[0].mxu0 }
  0xf0   : > { %v515_v12 = vadd.f32 %v513_v10, %v504_v11  ;;  %v506_v13 = vpop.f32.mrb[1].mxu0 }
  0xf1   : > { %v516_v14 = vadd.f32 %v513_v10, %v506_v13 }
  0xf2   : > { %v517_v16 = vmax.f32 %v515_v12, 0.0 }
  0xf3   : > { %v518_v15 = vmax.f32 %v516_v14, 0.0 }
  0xf5   : > { %740 = vmatprep.subr.msk.mxu1 %vm530_vm1, %v518_v15 }
  0xf6   : > { %741 = vmatpush1.msk.msra.mxu1 %vm530_vm1, %v517_v16 }
  0xf7   : > { %742 = vmatmul.mubr.msk.f32.vlgmr.msra.gmra.mrb[0].mxu1 %vm526_vm2, %v519_v17 }
 0x1ca   : > { %v603_v19 = vpop.f32.mrb[0].mxu1 }
 0x1cb   : > { %v604_v20 = vadd.f32 %v603_v19, %v524_v18  ;;  %v605_v21 = vpop.f32.mrb[1].mxu1 }
 0x1cc   : > { %v606_v22 = vadd.f32 %v605_v21, %v524_v18 }
 0x1cd   : > { %v608_v23 = vsub.f32 0.0, %v604_v20 }
 0x1ce   : > { %v609_v24 = vsub.f32 0.0, %v606_v22 }
 0x1cf   : > { %v610_v25 = vmul.f32 1.442695, %v608_v23 }
 0x1d0   : > { %v612_v26 = vmul.f32 1.442695, %v609_v24 }
 0x1d1   : > { %777 = vpow2.f32 %v610_v25 }
 0x1d2   : > { %779 = vpow2.f32 %v612_v26 }
 0x1db   : > { %v778_v27 = vpop.eup %777 }
 0x1dc   : > { %v780_v28 = vpop.eup %779  ;;  %v614_v29 = vadd.f32 1.0, %v778_v27 }
 0x1dd   : > { %v615_v30 = vadd.f32 1.0, %v780_v28 }
 0x1de   : > { %781 = vrcp.f32 %v614_v29 }
 0x1df   : > { %783 = vrcp.f32 %v615_v30 }
 0x1e8   : > { %v782_v31 = vpop.eup %781 }
 0x1e9   : > { %v784_v32 = vpop.eup %783  ;;  %v618_v33 = vmul.f32 %v782_v31, %v356_v5 }
 0x1ea   : > { %v619_v34 = vmul.f32 %v784_v32, %v357_v4 }
 0x1eb   : > { %620 = vst [vmem:[%s352_s24] sm:$0xff] %v618_v33 }
 0x1ec   : > { %621 = vst [vmem:[%s352_s24 + $0x8] sm:$0xff] %v619_v34 }
 0x1ed PF: > { %s17_s26 = sadd.s32 1, %s807_s26   ;;  %s915_s24 = smov %s803_s25 }
 0x1ee   : > { %p14_p5 = scmp.ge.s32.totalorder %s17_s26, 4   ;;  %s916_s25 = smov %s918_s27 }
 0x1f0   :  { %16 = sbr.rel (!%p14_p5) target bundleno = 2 (0x2), region = 81 }

</bundles_post_ra>
